<compile_context>
chip_gen: v7x
topology: tpu7x:2x2x1
jax: 0.10.0
libtpu: 0.0.40
codegen_flags: <defaults>
</compile_context>

<pallas_src>
import functools

import jax
import jax.numpy as jnp
from jax.experimental import pallas as pl
from jax.experimental.pallas import tpu as pltpu


def _round_up(x, m):
    return ((x + m - 1) // m) * m


def _sublane(itemsize):
    # (8,128) f32 tiles, (16,128) bf16, (32,128) int8.
    return max(8, 32 // itemsize)


def _vmem_budget_and_limit():
    """Per-generation VMEM budgeting.

    Returns (block_budget_bytes, vmem_limit_bytes).  v5e/v6e have 128 MiB of
    physical VMEM per TensorCore, v7x only 64 MiB -> gate on queried capacity
    (fall back to the conservative 64 MiB if the query fails).
    """
    cap = 64 * 1024 * 1024
    try:
        info = pltpu.get_tpu_info()
        cap = int(getattr(info, "vmem_capacity_bytes", cap) or cap)
    except Exception:
        pass
    budget = (3 * cap) // 8                               # 48 MiB / 24 MiB (v7x)
    limit = min((3 * cap) // 4, 96 * 1024 * 1024)         # 96 MiB / 48 MiB (v7x)
    return budget, limit


def _pick_tile_m(M, C, Co, itemsize, budget):
    """Largest multiple-of-128 lane tile whose double-buffered x+out (+weight)
    blocks fit `budget`, with (sublane,128) padding accounted for.  The grid
    uses pl.cdiv, so the tile does NOT have to divide M."""
    sub = _sublane(itemsize)
    c_pad, co_pad = _round_up(C, sub), _round_up(Co, sub)
    w_bytes = 2 * co_pad * _round_up(C, 128) * itemsize   # double-buffered weight
    per_col = 2 * (c_pad + co_pad) * itemsize             # double-buffered x + out
    cap = max(budget - w_bytes, 0) // per_col
    if cap >= M:
        return M                  # single full block (full dim is always legal)
    cap = (cap // 128) * 128
    # TODO(synk): if the (Co, C) weight alone blows the budget, tile K as well.
    return max(cap, 128) if M >= 128 else M


def _pick_tile_n(N, C, Co, Fg, itemsize, budget):
    """Row tile (multiple of 8) for the folded path."""
    sub = _sublane(itemsize)
    c_pad, co_pad = _round_up(C, sub), _round_up(Co, sub)
    per_row = 2 * (c_pad + co_pad) * Fg * itemsize        # double-buffered x + out
    cap = budget // per_row
    if cap >= N:
        return N
    cap = (cap // 8) * 8
    return max(cap, 8) if N >= 8 else N


# --------------------------------------------------------------------------
# Kernels
# --------------------------------------------------------------------------
def _mxu_kernel(x_ref, w_ref, o_ref):
    # x_ref: (C, TILE_M) lane-dense, w_ref: (Co, C), o_ref: (Co, TILE_M).
    o_ref[...] = jnp.dot(
        w_ref[...], x_ref[...], preferred_element_type=jnp.float32
    ).astype(o_ref.dtype)


def _bcast_kernel(C, Co, x_ref, w_ref, o_ref):
    # x_ref: (C, TILE_N, Fg) block read directly from x (original layout);
    # w_ref: full (G, Co, C) weight table in SMEM;
    # o_ref: (Co, TILE_N, Fg) block of the final [B, Co, G, N, Fg] output.
    # Channel mix as scalar-broadcast VPU mul-adds -> no relayout needed.
    g = pl.program_id(0)
    for o in range(Co):
        acc = w_ref[g, o, 0] * x_ref[0]
        for c in range(1, C):
            acc = acc + w_ref[g, o, c] * x_ref[c]
        o_ref[o] = acc.astype(o_ref.dtype)


# --------------------------------------------------------------------------
# pallas_call wrappers
# --------------------------------------------------------------------------
def _group_linear_mxu(xk, wk):
    """xk: [G, C, M] (M = B*N*Fg, lane-dense), wk: [G, Co, C] -> [G, Co, M]."""
    G, C, M = xk.shape
    Co = wk.shape[1]
    budget, limit = _vmem_budget_and_limit()
    tile_m = _pick_tile_m(M, C, Co, xk.dtype.itemsize, budget)
    cost = pl.CostEstimate(
        flops=2 * G * Co * C * M,
        transcendentals=0,
        bytes_accessed=(xk.size + wk.size + G * Co * M) * xk.dtype.itemsize,
    )
    return pl.pallas_call(
        _mxu_kernel,
        out_shape=jax.ShapeDtypeStruct((G, Co, M), xk.dtype),
        grid_spec=pltpu.PrefetchScalarGridSpec(
            num_scalar_prefetch=0,
            # g outermost -> each group's (Co, C) weight is DMA'd once and
            # stays VMEM-resident across all of its M tiles.
            grid=(G, pl.cdiv(M, tile_m)),
            in_specs=[
                pl.BlockSpec((None, C, tile_m), lambda g, m: (g, 0, m)),
                pl.BlockSpec((None, Co, C), lambda g, m: (g, 0, 0)),
            ],
            out_specs=pl.BlockSpec((None, Co, tile_m), lambda g, m: (g, 0, m)),
        ),
        compiler_params=pltpu.CompilerParams(
            # Both axes write disjoint output blocks -> fully parallel (lets
            # v7x megacore split whichever axis balances best).
            dimension_semantics=("parallel", "parallel"),
            vmem_limit_bytes=limit,
        ),
        cost_estimate=cost,
    )(xk, wk)


def _group_linear_folded(x, wk, groups, is_reshape):
    """Transpose-free path: reads x in its original HBM layout and writes the
    final [B, Co, G, N, Fg] layout directly from the kernel."""
    G = groups
    B, C = x.shape[0], x.shape[1]
    N = x.shape[-2]
    Fg = x.shape[-1] if is_reshape else x.shape[-1] // G
    Co = wk.shape[1]
    budget, limit = _vmem_budget_and_limit()
    # Moderate block budget here: the unrolled VPU chain keeps slab-sized
    # intermediates, so huge blocks only add VMEM spill pressure.
    tile_n = _pick_tile_n(N, C, Co, Fg, x.dtype.itemsize,
                          min(budget, 8 * 1024 * 1024))
    if is_reshape:   # x: [B, C, G, N, Fg]
        x_spec = pl.BlockSpec((None, C, None, tile_n, Fg),
                              lambda g, b, n: (b, 0, g, n, 0))
    else:            # x: [B, C, N, F]; group g = columns [g*Fg, (g+1)*Fg)
        x_spec = pl.BlockSpec((None, C, tile_n, Fg),
                              lambda g, b, n: (b, 0, n, g))
    out_spec = pl.BlockSpec((None, Co, None, tile_n, Fg),
                            lambda g, b, n: (b, 0, g, n, 0))
    cost = pl.CostEstimate(
        flops=2 * B * G * Co * C * N * Fg,
        transcendentals=0,
        bytes_accessed=(x.size + wk.size + B * Co * G * N * Fg)
        * x.dtype.itemsize,
    )
    return pl.pallas_call(
        functools.partial(_bcast_kernel, C, Co),
        out_shape=jax.ShapeDtypeStruct((B, Co, G, N, Fg), x.dtype),
        grid_spec=pltpu.PrefetchScalarGridSpec(
            num_scalar_prefetch=0,
            grid=(G, B, pl.cdiv(N, tile_n)),
            in_specs=[
                x_spec,
                # Tiny [G, Co, C] weight table lives in SMEM; the kernel reads
                # scalars w[g, o, c] for the broadcast multiply-adds.
                pl.BlockSpec(memory_space=pltpu.MemorySpace.SMEM),
            ],
            out_specs=out_spec,
        ),
        compiler_params=pltpu.CompilerParams(
            dimension_semantics=("parallel", "parallel", "parallel"),
            vmem_limit_bytes=limit,
        ),
        cost_estimate=cost,
    )(x, wk)


# --------------------------------------------------------------------------
# Forward
# --------------------------------------------------------------------------
def group_linear_forward(x, weight, groups, is_reshape=False):
    """JAX/Pallas port of Group_Linear.forward (bias=False).

    Args:
      x: [B, C, N, F] if not is_reshape, else [B, C, G, N, F//G].
      weight: grouped 1x1-conv weight, [Co*G, C] (or [Co*G, C, 1, 1]); output
        channel o of group g uses row weight[g*Co + o, :].
      groups: G.
    Returns:
      [B, Co, G, N, F//G].
    """
    if weight.ndim == 4:            # accept the raw Conv2d [Co*G, C, 1, 1] shape
        weight = weight.reshape(weight.shape[0], weight.shape[1])
    G = groups
    B, C = x.shape[0], x.shape[1]
    N = x.shape[-2]
    Fg = x.shape[-1] if is_reshape else x.shape[-1] // G
    Co = weight.shape[0] // G
    wk = weight.reshape(G, Co, C)

    # Fast path: lane-aligned Fg and a small channel mix -> read x / write out
    # directly in their HBM layouts (removes ~2 full HBM passes of transpose
    # traffic; this op is bandwidth bound for small C, Co).
    if Fg % 128 == 0 and C * Co <= 16 * (C + Co) and C * Co <= 256:
        return _group_linear_folded(x, wk, G, is_reshape)
    # TODO(synk): an MXU variant of the folded path (for large C*Co with
    # Fg % 128 == 0) needs an in-kernel (C, TILE_N, Fg)->(C, TILE_N*Fg)
    # relayout; until then large-channel cases take the transpose path below.

    # General path: fold batch into the lane axis so every grid step is one
    # big lane-dense (Co, C) @ (C, TILE_M) MXU matmul per group.
    if is_reshape:
        xk = x.transpose(2, 1, 0, 3, 4)                        # [G, C, B, N, Fg]
    else:
        xk = x.reshape(B, C, N, G, Fg).transpose(3, 1, 0, 2, 4)
    xk = xk.reshape(G, C, B * N * Fg)
    out = _group_linear_mxu(xk, wk)                            # [G, Co, B*N*Fg]
    return out.reshape(G, Co, B, N, Fg).transpose(2, 1, 0, 3, 4)


def init_group_linear_params(key, in_channels, out_channels, groups):
    """Scale-matched Conv2d init: kaiming_uniform(a=sqrt(5)) on a 1x1 kernel ->
    U(-1/sqrt(C), 1/sqrt(C)); returned squeezed to [Co*G, C]."""
    bound = 1.0 / jnp.sqrt(jnp.float32(in_channels))
    return jax.random.uniform(
        key, (out_channels * groups, in_channels),
        minval=-bound, maxval=bound, dtype=jnp.float32,
    )


def group_linear_reference(x, weight, groups, is_reshape=False):
    """Pure-JAX mirror of the PyTorch forward (grouped 1x1 conv, bias=False)."""
    B, C = x.shape[0], x.shape[1]
    N = x.shape[-2]
    G = groups
    Co = weight.shape[0] // G
    if not is_reshape:
        x = jnp.swapaxes(x.reshape(B, C, N, G, -1), 2, 3)      # [B, C, G, N, Fg]
    x = jnp.swapaxes(x, 1, 2).reshape(B, G * C, N, -1)         # [B, G*C, N, Fg]
    Fg = x.shape[-1]
    # Conv2d(groups=G): group g maps input chans [g*C,(g+1)*C) to output chans
    # [g*Co,(g+1)*Co) using weight rows g*Co + o.
    xg = x.reshape(B, G, C, N, Fg)
    wg = weight.reshape(G, Co, C)
    out = jnp.einsum("bgcnf,goc->bgonf", xg, wg)               # [B, G, Co, N, Fg]
    out = jnp.swapaxes(out, 1, 2)                              # [B, Co, G, N, Fg]
    return out


if __name__ == "__main__":
    key = jax.random.PRNGKey(0)
    # (B, C, N, F-or-Fg, G, Co, is_reshape)
    cases = [
        (2, 4, 16, 32, 2, 8, False),    # Fg=16  -> general MXU path
        (2, 4, 16, 256, 2, 8, False),   # Fg=128 -> folded path (no transposes)
        (2, 4, 16, 16, 2, 8, True),     # pre-reshaped input, general path
        (2, 4, 16, 128, 2, 8, True),    # pre-reshaped input, folded path
    ]
    for i, (B, C, N, F, G, Co, is_reshape) in enumerate(cases):
        key, kx, kw = jax.random.split(key, 3)
        if is_reshape:
            x = jax.random.normal(kx, (B, C, G, N, F), dtype=jnp.float32)
            Fg = F
        else:
            x = jax.random.normal(kx, (B, C, N, F), dtype=jnp.float32)
            Fg = F // G
        weight = init_group_linear_params(kw, C, Co, G)        # [Co*G, C]

        fwd = jax.jit(functools.partial(group_linear_forward, groups=G,
                                        is_reshape=is_reshape))
        out = jax.block_until_ready(fwd(x, weight))
        assert out.shape == (B, Co, G, N, Fg), (i, out.shape)

        ref = group_linear_reference(x, weight, G, is_reshape)
        assert jnp.allclose(out, ref, atol=1e-5, rtol=1e-5), f"case {i} mismatch"

    print("KERNEL_OK")
</pallas_src>

<mosaic_0001>
module attributes {stable_mosaic.version = 11 : i64} {
  func.func @_mxu_kernel(%arg0: i32, %arg1: i32, %arg2: memref<1x4x512xf32, #tpu.memory_space<vmem>>, %arg3: memref<1x8x4xf32, #tpu.memory_space<vmem>>, %arg4: memref<1x8x512xf32, #tpu.memory_space<vmem>>) attributes {dimension_semantics = [#tpu.dimension_semantics<parallel>, #tpu.dimension_semantics<parallel>], iteration_bounds = array<i64: 2, 1>, scalar_prefetch = 0 : i64, scratch_operands = 0 : i64, tpu.core_type = #tpu.core_type<tc>, window_params = [{transform_indices = @transform_0, window_bounds = array<i64: 1, 4, 512>}, {transform_indices = @transform_1, window_bounds = array<i64: 1, 8, 4>}, {transform_indices = @transform_2, window_bounds = array<i64: 1, 8, 512>}]} {
    %c0 = arith.constant 0 : index
    %c0_0 = arith.constant 0 : index
    %c0_1 = arith.constant 0 : index
    %0 = vector.load %arg3[%c0, %c0_0, %c0_1] : memref<1x8x4xf32, #tpu.memory_space<vmem>>, vector<1x8x4xf32>
    %1 = vector.shape_cast %0 : vector<1x8x4xf32> to vector<8x4xf32>
    %c0_2 = arith.constant 0 : index
    %c0_3 = arith.constant 0 : index
    %c0_4 = arith.constant 0 : index
    %2 = vector.load %arg2[%c0_2, %c0_3, %c0_4] : memref<1x4x512xf32, #tpu.memory_space<vmem>>, vector<1x4x512xf32>
    %3 = vector.shape_cast %2 : vector<1x4x512xf32> to vector<4x512xf32>
    %cst = arith.constant dense<0.000000e+00> : vector<8x512xf32>
    %4 = tpu.matmul %1, %3, %cst {dimension_numbers = #tpu.dot_dimension_numbers<[1], [0], [0], [1], [0, 0, 1, 1], [], []>} : vector<8x4xf32>, vector<4x512xf32>, vector<8x512xf32> -> vector<8x512xf32>
    %c0_5 = arith.constant 0 : index
    %c0_6 = arith.constant 0 : index
    %c0_7 = arith.constant 0 : index
    %5 = vector.load %arg4[%c0_5, %c0_6, %c0_7] : memref<1x8x512xf32, #tpu.memory_space<vmem>>, vector<1x8x512xf32>
    %6 = vector.shape_cast %5 : vector<1x8x512xf32> to vector<8x512xf32>
    %7 = vector.shape_cast %4 : vector<8x512xf32> to vector<1x8x512xf32>
    tpu.vector_store %arg4[%c0_5, %c0_6, %c0_7], %7 {strides = array<i32>} : memref<1x8x512xf32, #tpu.memory_space<vmem>>, vector<1x8x512xf32>,
    return
  }
  func.func @transform_0(%arg0: i32, %arg1: i32) -> (i32, i32, i32) {
    %c0_i32 = arith.constant 0 : i32
    %c0_i32_0 = arith.constant 0 : i32
    return %arg0, %c0_i32, %arg1 : i32, i32, i32
  }
  func.func @transform_1(%arg0: i32, %arg1: i32) -> (i32, i32, i32) {
    %c0_i32 = arith.constant 0 : i32
    %c0_i32_0 = arith.constant 0 : i32
    %c0_i32_1 = arith.constant 0 : i32
    return %arg0, %c0_i32, %c0_i32_0 : i32, i32, i32
  }
  func.func @transform_2(%arg0: i32, %arg1: i32) -> (i32, i32, i32) {
    %c0_i32 = arith.constant 0 : i32
    %c0_i32_0 = arith.constant 0 : i32
    return %arg0, %c0_i32, %arg1 : i32, i32, i32
  }
}

</mosaic_0001>

<bundles_post_ra>
// kernel: group_linear_forward.1
= control target key start
LH: loop header
LB: loop body
LE: loop exit
PB: predicated region body
PF: predicated region fallthrough
CT: control target
= control target key end

     0   :  { %s552_s9 = smov 0   ;;  %s554_s10 = smov 0   ;;  %s588_s0 = inlined_call_operand.vmem [shape: f32[2,4,512], index: 0, kind: input, shape index: {}]   ;;  %s589_s1 = inlined_call_operand.vmem [shape: f32[2,8,4], index: 1, kind: input, shape index: {}]   ;;  %s590_s2 = inlined_call_operand.vmem [shape: f32[2,8,512], index: 2, kind: output, shape index: {}]  }
   0x1   :  { %s556_s11 = smov 0  }
   0x2 LB: > { %s24_s12 = sadd.s32 1, %s530_s10  ;;  %p469_p0 = scmp.ge.s32.totalorder %s534_s11, 1  ;;  %s534_s11 = sphi %s556_s11, %s12_s11   ;;  %s530_s10 = sphi %s554_s10, %s592_s10   ;;  %s526_s9 = sphi %s552_s9, %s591_s9  }
   0x3   : > { %p26_p1 = scmp.ge.s32.totalorder %s24_s12, 2  ;;  %p142_p2 = scmp.lt.s32.totalorder %s534_s11, 3 }
   0x5   : > { %s594_s12 = smov (%p26_p1, %s24_s12), 0  ;;  %p143_p3 = pnand %p469_p0, %p142_p2 }
   0x6   : > { %p177_p4 = scmp.lt.s32.totalorder (!%p143_p3), %s526_s9, 1  ;;  %v536_v0 = vmov (!%p143_p3), 0.0   ;;  %vm211_vm0 = vcmask (!%p143_p3), 1043456   ;;  %vm207_vm1 = vcmask (!%p143_p3), 31744  }
   0x7   : > { %146 = sbr.rel (%p143_p3) target bundleno = 236 (0xec), region = 28  ;;  %284 = vmatprep.mubr.f32.mxu0 (!%p143_p3), %v536_v0  ;;  %355 = vmatprep.mubr.f32.mxu1 (!%p143_p3), %v536_v0 }
   0xe   : > { %s596_s9 = smov (!%p177_p4, %s526_s9), 1 }
   0xf   : > { %s483_s13 = sshll.u32 %s596_s9, 4  ;;  %s472_s14 = sshll.u32 %s596_s9, 3 }
  0x10   : > { %s184_s17 = scalar_lea.vmem %s588_s0, %s483_s13  ;;  %s189_s20 = scalar_lea.vmem %s589_s1, %s472_s14 }
  0x11   : > { %v201_v1 = vld [vmem:[%s184_s17] sm:$0xff]  ;;  %v202_v2 = vld [vmem:[%s184_s17 + $0x8] sm:$0xff]  ;;  %s484_s21 = sshll.u32 %s596_s9, 5 }
  0x12   : > { %v205_v3 = vcombine.high %v201_v1, %v201_v1  ;;  %v206_v4 = vcombine.high %v202_v2, %v202_v2  ;;  %v200_v5 = vld [vmem:[%s189_s20] sm:$0xff]  ;;  %s198_s24 = scalar_lea.vmem %s590_s2, %s484_s21 }
  0x14   : > { %475 = vmatprep.subr.msk.mxu0 %vm211_vm0, %v205_v3  ;;  %478 = vmatprep.subr.msk.mxu1 %vm211_vm0, %v206_v4 }
  0x15   : > { %476 = vmatpush1.msk.msra.mxu0 %vm211_vm0, %v201_v1  ;;  %479 = vmatpush1.msk.msra.mxu1 %vm211_vm0, %v202_v2 }
  0x16   : > { %477 = vmatmul.mubr.msk.f32.vlgmr.msra.gmra.mrb[0].mxu0 %vm207_vm1, %v200_v5  ;;  %480 = vmatmul.mubr.msk.f32.vlgmr.msra.gmra.mrb[0].mxu1 %vm207_vm1, %v200_v5 }
  0xe9   : > { %v286_v6 = vpop.f32.mrb[0].mxu0  ;;  %v357_v7 = vpop.f32.mrb[0].mxu1 }
  0xea   : > { %362 = vst [vmem:[%s198_s24] sm:$0xff] %v286_v6  ;;  %364 = vst [vmem:[%s198_s24 + $0x10] sm:$0xff] %v357_v7  ;;  %v288_v8 = vpop.f32.mrb[1].mxu0  ;;  %v359_v9 = vpop.f32.mrb[1].mxu1 }
  0xeb   : > { %363 = vst [vmem:[%s198_s24 + $0x8] sm:$0xff] %v288_v8  ;;  %365 = vst [vmem:[%s198_s24 + $0x18] sm:$0xff] %v359_v9 }
  0xec PF: > { %s12_s11 = sadd.s32 1, %s534_s11   ;;  %s591_s9 = smov %s530_s10 }
  0xed   : > { %p9_p5 = scmp.ge.s32.totalorder %s12_s11, 4   ;;  %s592_s10 = smov %s594_s12 }
  0xef   :  { %11 = sbr.rel (!%p9_p5) target bundleno = 2 (0x2), region = 61 }

</bundles_post_ra>
